<compile_context>
chip_gen: v7x
topology: tpu7x:2x2x1
jax: 0.10.0
libtpu: 0.0.40
codegen_flags: <defaults>
</compile_context>

<pallas_src>
import jax
import jax.numpy as jnp
from jax.experimental import pallas as pl
from jax.experimental.pallas import tpu as pltpu

NEG_SLOPE = 0.01  # F.leaky_relu default negative slope


def setblock_kernel(x_ref, k_ref, o_ref):
    # x_ref: (B, H+2, W*Cin)       bf16, height-padded in the wrapper
    # k_ref: (3, W*Cin, 2*CWOP)    bf16 banded conv weights (even cols | odd cols)
    # o_ref: (B, HO, CWOP)         f32 pooled + leaky_relu output (lane-padded)
    B, HP, WC = x_ref.shape
    H = HP - 2
    HO, CWOP = o_ref.shape[1], o_ref.shape[2]

    # 3x3 conv as 3 row-shifted matmuls; kernel-column taps (dx) and width
    # zero-padding are folded into the band structure of k_ref.  Even/odd
    # output columns live in the two lane halves of a single accumulator.
    acc = jnp.zeros((B * H, 2 * CWOP), jnp.float32)
    for dy in range(3):
        xs = x_ref[:, dy:dy + H, :].reshape(B * H, WC)
        acc = acc + jnp.dot(xs, k_ref[dy], preferred_element_type=jnp.float32)

    # MaxPool2d(2): width half = max of the two (128-aligned) lane halves,
    # height half = size-2 reduction over adjacent rows.
    m = jnp.maximum(acc[:, :CWOP], acc[:, CWOP:])        # (B*H, CWOP)
    m = jnp.max(m.reshape(B, HO, 2, CWOP), axis=2)       # (B, HO, CWOP)

    # leaky_relu commutes with max -> apply once on the pooled tensor (in f32)
    m = jnp.where(m > 0, m, NEG_SLOPE * m)
    o_ref[...] = m.astype(o_ref.dtype)


def _vmem_capacity_bytes():
    try:
        info = pltpu.get_tpu_info()
        for attr in ("vmem_capacity_bytes", "vmem_bytes", "vmem_size_bytes"):
            v = getattr(info, attr, None)
            if v:
                return int(v)
    except Exception:
        pass
    return 128 << 20  # v5e/v6e physical VMEM fallback


def set_block_forward(x, weight):
    """SetBlock(BasicConv2d(c_in, c_out, 3, padding=1), pooling=True).forward

    x:      (n, s, c, h, w)      float32 (PyTorch layout)
    weight: (c_out, c_in, 3, 3)  float32 (PyTorch OIHW)
    returns (n, s, c_out, h//2, w//2)
    """
    n, s, c, h, w = x.shape
    cout = weight.shape[0]
    assert h % 2 == 0 and w % 2 == 0, "MaxPool2d(2) needs even spatial dims"
    N = n * s
    ho, wo = h // 2, w // 2
    wc = w * c
    cwo = cout * wo
    lane = lambda d: -(-d // 128) * 128
    sub8 = lambda d: -(-d // 8) * 8
    cwo_pad = lane(cwo)          # lane-dense output / vreg-aligned parity halves
    out_dtype = x.dtype

    # ---- banded conv weights, split by output-column parity along lanes:
    #   kmat[dy][xi*c + ci, p*cwo_pad + co*wo + xo] = weight[co, ci, dy, dx]
    #   where xi = 2*xo + p + dx - 1  (no match outside [0, w) -> width zero-pad)
    dx = jnp.arange(3).reshape(3, 1, 1, 1)
    par = jnp.arange(2).reshape(1, 2, 1, 1)
    xi = jnp.arange(w).reshape(1, 1, w, 1)
    xo = jnp.arange(wo).reshape(1, 1, 1, wo)
    band = (xi == 2 * xo + par + dx - 1).astype(weight.dtype)      # (3, 2, w, wo)
    kmat = jnp.einsum('dpXx,ocyd->ypXcox', band, weight)           # (3,2,w,ci,co,wo)
    kmat = kmat.reshape(3, 2, wc, cwo)
    kmat = jnp.pad(kmat, ((0, 0), (0, 0), (0, 0), (0, cwo_pad - cwo)))
    kmat = jnp.transpose(kmat, (0, 2, 1, 3)).reshape(3, wc, 2 * cwo_pad)
    kmat = kmat.astype(jnp.bfloat16)
    # TODO(synk): for very large w*cin*cout the banded weight is O(w^2*cin*cout/3);
    # tile it over output-width (2nd grid axis) and single-buffer it before it
    # outgrows v7x's 64 MiB/TC.  Unnecessary for these layer sizes.

    # ---- VMEM-budget-driven batch size (counts accumulator + double buffers);
    #      grid kept even and >= 2 so both v7x TensorCores get work.
    vmem_cap = _vmem_capacity_bytes()
    vmem_limit = int(min(vmem_cap // 2, 64 << 20))
    budget = (vmem_limit * 3) // 4
    per_img = (2 * 2 * (h + 2) * lane(wc)        # bf16 input block, double-buffered
               + 2 * 4 * ho * cwo_pad            # f32 output block, double-buffered
               + 4 * h * lane(2 * cwo_pad)       # f32 accumulator
               + 2 * h * lane(wc))               # shifted-view relayout temp (bf16)
    fixed = 2 * 2 * 3 * sub8(wc) * lane(2 * cwo_pad)   # bf16 weights, double-buffered
    cap_imgs = max(1, (budget - fixed) // per_img)
    grid = -(-N // cap_imgs)
    if N >= 2:
        grid = max(grid, 2)
        if grid % 2:
            grid += 1
    B = -(-N // grid)
    Npad = grid * B

    # ---- input relayout: NCHW frames -> rows of W*Cin lanes; height pad and
    #      batch pad folded into this single HBM pass; bf16 halves traffic.
    x_rows = jnp.transpose(x.reshape(N, c, h, w), (0, 2, 3, 1)).reshape(N, h, wc)
    x_rows = jnp.pad(x_rows, ((0, Npad - N), (1, 1), (0, 0))).astype(jnp.bfloat16)

    out = pl.pallas_call(
        setblock_kernel,
        out_shape=jax.ShapeDtypeStruct((Npad, ho, cwo_pad), out_dtype),
        grid_spec=pltpu.PrefetchScalarGridSpec(
            num_scalar_prefetch=0,
            grid=(grid,),
            in_specs=[
                pl.BlockSpec((B, h + 2, wc), lambda i: (i, 0, 0)),
                pl.BlockSpec((3, wc, 2 * cwo_pad), lambda i: (0, 0, 0)),
            ],
            out_specs=pl.BlockSpec((B, ho, cwo_pad), lambda i: (i, 0, 0)),
        ),
        compiler_params=pltpu.CompilerParams(
            dimension_semantics=("parallel",),
            vmem_limit_bytes=vmem_limit),
    )(x_rows, kmat)

    # glue: lane-dense (Npad, ho, cout*wo_pad) -> (n, s, cout, ho, wo).
    # (Lane-dense kernel stores beat emitting NCHW from the kernel, which would
    #  force wo-wide masked stores; the pooled output is 4x smaller than x, so
    #  this post-pass is cheap.)
    out = out[:N, :, :cwo].reshape(N, ho, cout, wo).transpose(0, 2, 1, 3)
    return out.reshape(n, s, cout, ho, wo)


if __name__ == "__main__":
    key = jax.random.PRNGKey(0)
    k_x, k_w = jax.random.split(key)

    # small shapes consistent with the module's forward
    n, s, c_in, h, w = 2, 4, 4, 16, 16
    c_out = 8

    x = jax.random.normal(k_x, (n, s, c_in, h, w), jnp.float32)
    weight = jax.random.normal(k_w, (c_out, c_in, 3, 3), jnp.float32) * 0.1

    out = jax.block_until_ready(set_block_forward(x, weight))
    assert out.shape == (n, s, c_out, h // 2, w // 2)

    # pure-JAX reference: frame-wise conv3x3(SAME) + leaky_relu + maxpool 2x2,
    # using the same bf16 quantization of inputs/weights the kernel uses.
    xq = x.astype(jnp.bfloat16).astype(jnp.float32)
    wq = weight.astype(jnp.bfloat16).astype(jnp.float32)
    x_nhwc = jnp.transpose(xq.reshape(n * s, c_in, h, w), (0, 2, 3, 1))
    w_hwio = jnp.transpose(wq, (2, 3, 1, 0))
    ref = jax.lax.conv_general_dilated(
        x_nhwc, w_hwio, window_strides=(1, 1), padding="SAME",
        dimension_numbers=("NHWC", "HWIO", "NHWC"),
        precision=jax.lax.Precision.HIGHEST)
    ref = jnp.where(ref > 0, ref, NEG_SLOPE * ref)
    ref = ref.reshape(n * s, h // 2, 2, w // 2, 2, c_out).max(axis=(2, 4))
    ref = jnp.transpose(ref, (0, 3, 1, 2)).reshape(n, s, c_out, h // 2, w // 2)
    err = float(jnp.max(jnp.abs(out - ref)))
    assert err < 2e-3, f"mismatch vs reference: {err}"

    print("KERNEL_OK")
</pallas_src>

<mosaic_0001>
module attributes {stable_mosaic.version = 11 : i64} {
  func.func @setblock_kernel(%arg0: i32, %arg1: memref<4x18x64xbf16, #tpu.memory_space<vmem>>, %arg2: memref<3x64x256xbf16, #tpu.memory_space<vmem>>, %arg3: memref<4x8x128xf32, #tpu.memory_space<vmem>>) attributes {dimension_semantics = [#tpu.dimension_semantics<parallel>], iteration_bounds = array<i64: 2>, scalar_prefetch = 0 : i64, scratch_operands = 0 : i64, tpu.core_type = #tpu.core_type<tc>, window_params = [{transform_indices = @transform_0, window_bounds = array<i64: 4, 18, 64>}, {pipeline_mode = #tpu.pipeline_mode<synchronous>, transform_indices = @transform_1, window_bounds = array<i64: 3, 64, 256>}, {transform_indices = @transform_2, window_bounds = array<i64: 4, 8, 128>}]} {
    %cst = arith.constant 0.000000e+00 : f32
    %0 = vector.broadcast %cst : f32 to vector<64x256xf32>
    %c0 = arith.constant 0 : index
    %c0_0 = arith.constant 0 : index
    %c0_1 = arith.constant 0 : index
    %1 = vector.load %arg1[%c0, %c0_0, %c0_1] : memref<4x18x64xbf16, #tpu.memory_space<vmem>>, vector<4x16x64xbf16>
    %2 = vector.shape_cast %1 : vector<4x16x64xbf16> to vector<64x64xbf16>
    %c0_2 = arith.constant 0 : index
    %c0_3 = arith.constant 0 : index
    %c0_4 = arith.constant 0 : index
    %3 = vector.load %arg2[%c0_2, %c0_3, %c0_4] : memref<3x64x256xbf16, #tpu.memory_space<vmem>>, vector<1x64x256xbf16>
    %4 = vector.shape_cast %3 : vector<1x64x256xbf16> to vector<64x256xbf16>
    %cst_5 = arith.constant dense<0.000000e+00> : vector<64x256xf32>
    %5 = tpu.matmul %2, %4, %cst_5 {dimension_numbers = #tpu.dot_dimension_numbers<[1], [0], [0], [1], [0, 0, 1, 1], [], []>} : vector<64x64xbf16>, vector<64x256xbf16>, vector<64x256xf32> -> vector<64x256xf32>
    %6 = arith.addf %0, %5 : vector<64x256xf32>
    %c0_6 = arith.constant 0 : index
    %c1 = arith.constant 1 : index
    %c0_7 = arith.constant 0 : index
    %7 = vector.load %arg1[%c0_6, %c1, %c0_7] : memref<4x18x64xbf16, #tpu.memory_space<vmem>>, vector<4x16x64xbf16>
    %8 = vector.shape_cast %7 : vector<4x16x64xbf16> to vector<64x64xbf16>
    %c1_8 = arith.constant 1 : index
    %c0_9 = arith.constant 0 : index
    %c0_10 = arith.constant 0 : index
    %9 = vector.load %arg2[%c1_8, %c0_9, %c0_10] : memref<3x64x256xbf16, #tpu.memory_space<vmem>>, vector<1x64x256xbf16>
    %10 = vector.shape_cast %9 : vector<1x64x256xbf16> to vector<64x256xbf16>
    %cst_11 = arith.constant dense<0.000000e+00> : vector<64x256xf32>
    %11 = tpu.matmul %8, %10, %cst_11 {dimension_numbers = #tpu.dot_dimension_numbers<[1], [0], [0], [1], [0, 0, 1, 1], [], []>} : vector<64x64xbf16>, vector<64x256xbf16>, vector<64x256xf32> -> vector<64x256xf32>
    %12 = arith.addf %6, %11 : vector<64x256xf32>
    %c0_12 = arith.constant 0 : index
    %c2 = arith.constant 2 : index
    %c0_13 = arith.constant 0 : index
    %13 = vector.load %arg1[%c0_12, %c2, %c0_13] : memref<4x18x64xbf16, #tpu.memory_space<vmem>>, vector<4x16x64xbf16>
    %14 = vector.shape_cast %13 : vector<4x16x64xbf16> to vector<64x64xbf16>
    %c2_14 = arith.constant 2 : index
    %c0_15 = arith.constant 0 : index
    %c0_16 = arith.constant 0 : index
    %15 = vector.load %arg2[%c2_14, %c0_15, %c0_16] : memref<3x64x256xbf16, #tpu.memory_space<vmem>>, vector<1x64x256xbf16>
    %16 = vector.shape_cast %15 : vector<1x64x256xbf16> to vector<64x256xbf16>
    %cst_17 = arith.constant dense<0.000000e+00> : vector<64x256xf32>
    %17 = tpu.matmul %14, %16, %cst_17 {dimension_numbers = #tpu.dot_dimension_numbers<[1], [0], [0], [1], [0, 0, 1, 1], [], []>} : vector<64x64xbf16>, vector<64x256xbf16>, vector<64x256xf32> -> vector<64x256xf32>
    %18 = arith.addf %12, %17 : vector<64x256xf32>
    %19 = vector.extract_strided_slice %18 {offsets = [0, 0], sizes = [64, 128], strides = [1, 1]} : vector<64x256xf32> to vector<64x128xf32>
    %20 = vector.extract_strided_slice %18 {offsets = [0, 128], sizes = [64, 128], strides = [1, 1]} : vector<64x256xf32> to vector<64x128xf32>
    %21 = arith.maximumf %19, %20 : vector<64x128xf32>
    %22 = vector.shape_cast %21 : vector<64x128xf32> to vector<4x8x2x128xf32>
    %cst_18 = arith.constant dense<0xFF800000> : vector<4x8x128xf32>
    %23 = vector.multi_reduction <maximumf>, %22, %cst_18 [2] : vector<4x8x2x128xf32> to vector<4x8x128xf32>
    %cst_19 = arith.constant 0.000000e+00 : f32
    %24 = vector.broadcast %cst_19 : f32 to vector<4x8x128xf32>
    %25 = arith.cmpf ogt, %23, %24 : vector<4x8x128xf32>
    %cst_20 = arith.constant 0.00999999977 : f32
    %26 = vector.broadcast %cst_20 : f32 to vector<4x8x128xf32>
    %27 = arith.mulf %26, %23 : vector<4x8x128xf32>
    %28 = arith.select %25, %23, %27 : vector<4x8x128xi1>, vector<4x8x128xf32>
    %c0_21 = arith.constant 0 : index
    %c0_22 = arith.constant 0 : index
    %c0_23 = arith.constant 0 : index
    %29 = vector.load %arg3[%c0_21, %c0_22, %c0_23] : memref<4x8x128xf32, #tpu.memory_space<vmem>>, vector<4x8x128xf32>
    tpu.vector_store %arg3[%c0_21, %c0_22, %c0_23], %28 {strides = array<i32>} : memref<4x8x128xf32, #tpu.memory_space<vmem>>, vector<4x8x128xf32>,
    return
  }
  func.func @transform_0(%arg0: i32) -> (i32, i32, i32) {
    %c0_i32 = arith.constant 0 : i32
    %c0_i32_0 = arith.constant 0 : i32
    %c0_i32_1 = arith.constant 0 : i32
    return %arg0, %c0_i32, %c0_i32_0 : i32, i32, i32
  }
  func.func @transform_1(%arg0: i32) -> (i32, i32, i32) {
    %c0_i32 = arith.constant 0 : i32
    %c0_i32_0 = arith.constant 0 : i32
    %c0_i32_1 = arith.constant 0 : i32
    %c0_i32_2 = arith.constant 0 : i32
    return %c0_i32, %c0_i32_0, %c0_i32_1 : i32, i32, i32
  }
  func.func @transform_2(%arg0: i32) -> (i32, i32, i32) {
    %c0_i32 = arith.constant 0 : i32
    %c0_i32_0 = arith.constant 0 : i32
    %c0_i32_1 = arith.constant 0 : i32
    return %arg0, %c0_i32, %c0_i32_0 : i32, i32, i32
  }
}

</mosaic_0001>

<bundles_post_ra>
// kernel: tpu_custom_call.1
= control target key start
LH: loop header
LB: loop body
LE: loop exit
PB: predicated region body
PF: predicated region fallthrough
CT: control target
= control target key end

     0   :  { %7 = vsyncpa [#allocation3], 0  ;;  %s2379_s0 = inlined_call_operand.hbm [shape: bf16[8,18,64], index: 0, kind: input, shape index: {}]   ;;  %s2380_s1 = inlined_call_operand.hbm [shape: bf16[3,64,256], index: 1, kind: input, shape index: {}]   ;;  %s2381_s2 = inlined_call_operand.hbm [shape: f32[8,8,128], index: 2, kind: output, shape index: {}]  }
   0x1   :  { %9 = vsyncpa [#allocation3 + $0x1], 0 }
   0x2   :  { %10 = vsyncpa [#allocation6], 0 }
   0x3   :  { %11 = vsyncpa [#allocation4], 0 }
   0x4   :  { %13 = vsyncpa [#allocation4 + $0x1], 0  ;;  %s1846_s9 = smov 0   ;;  %s1848_s10 = smov 0  }
   0x5   :  { %s1850_s11 = smov 0   ;;  %s1852_s12 = smov 0  }
   0x6 LB: > { %s1867_s13 = sadd.s32 4294967295, %s1818_s12   ;;  %s1474_s14 = sadd.s32 4294967294, %s1818_s12   ;;  %s1818_s12 = sphi %s1852_s12, %s2405_s12   ;;  %s1814_s11 = sphi %s1850_s11, %s2404_s11   ;;  %s1810_s10 = sphi %s1848_s10, %s2403_s10   ;;  %s1806_s9 = sphi %s1846_s9, %s2402_s9  }
   0x7   : > { %p39_p0 = scmp.ne.s32.totalorder %s1810_s10, %s1806_s9  ;;  %p2382_p1 = scmp.eq.s32.totalorder %s1867_s13, 0 }
   0x8   : > { %p90_p3 = scmp.eq.s32.totalorder %s1474_s14, 1  ;;  %p1475_p5 = scmp.ge.s32.totalorder %s1818_s12, 1 }
   0x9   : > { %p1876_p4 = por %p2382_p1, %p39_p0  ;;  %p97_p7 = scmp.lt.s32.totalorder %s1818_s12, 3 }
   0xa   : > { %p1881_p6 = por %p90_p3, %p39_p0  ;;  %s1820_s18 = smov [#allocation5]  }
   0xb   : > { %s2385_s15 = scalar_select %p1876_p4, 1, 0 }
   0xc   : > { %s2386_s16 = scalar_select %p1881_p6, 1, 0 }
   0xd   : > { %p1886_p8 = pnand %p1475_p5, %p97_p7  ;;  %s109_s19 = sshll.u32 %s1820_s18, 4  ;;  %s1890_s19 = int_to_ptr.vmem [resolvable:$true] %s109_s19 }
   0xe   : > { %s1902_s21 = sadd.s32 1, %s1818_s12   ;;  %s26_s22 = sadd.s32 1, %s1814_s11 }
   0xf   : > { %s2387_s17 = scalar_select %p1886_p8, 1, 0 }
  0x10   : > { %p1593_p9 = pneg %p1886_p8  ;;  %s23_s23 = ssub.s32 %s1818_s12, %s1902_s21 }
  0x11   : > { %s1690_s26 = scalar_lea.hbm %s2380_s1, 3072 }
  0x12   : > { %p1897_p11 = pnand %p1593_p9, %p2382_p1  ;;  %p1691_p12 = scmp.ne.s32.totalorder %s2380_s1, %s1690_s26 }
  0x13   : > { %p1697_p5 = scmp.lt.u32.totalorder %s1690_s26, %s2380_s1 }
  0x14   : > { %p1692_p13 = pneg %p1897_p11 }
  0x16   : > { %p1693_p0 = pnand %p1692_p13, %p1691_p12 }
  0x18   : > { %p1694_p3 = pneg %p1693_p0 }
  0x1a   : > { %p1699_p7 = pnand %p1697_p5, %p1694_p3 }
  0x1c   : > { %1702 = shalt.err (!%p1699_p7)
}
  0x1d   : > { %s1703_s3 = scalar_lea.vmem %s1890_s19, 3072  ;;  %p1711_p2 = scmp.lt.s32.totalorder %s1890_s19, %s1890_s19 }
  0x1e   : > { %p1704_p9 = scmp.ne.s32.totalorder %s1890_s19, %s1703_s3  ;;  %p1712_p6 = scmp.lt.s32.totalorder %s1703_s3, %s1703_s3 }
  0x20   : > { %p1706_p10 = pnand %p1704_p9, %p1692_p13  ;;  %p1713_p4 = por %p1712_p6, %p1711_p2 }
  0x22   : > { %p1707_p1 = pneg %p1706_p10 }
  0x24   : > { %p1714_p8 = pnand %p1713_p4, %p1707_p1 }
  0x26   : > { %1717 = shalt.err (!%p1714_p8)
}
  0x27   : > { %s1821_s4 = smov 128   ;;  %s1822_s5 = smov 8  }
  0x28   : > { %1596 = dma.hbm_to_vmem [thread:$0]  (!%p1897_p11), %s2380_s1, 3072, %s1890_s19, [#allocation6], %s1821_s4, %s1821_s4, %s1822_s5  }
  0x29   : > { %p24_p2 = scmp.eq.s32.totalorder %s23_s23, 0  ;;  %p33_p1 = scmp.ne.s32.totalorder %s1814_s11, %s1810_s10 }
  0x2a   : > { %p34_p4 = scmp.eq.s32.totalorder %s1818_s12, 0  ;;  %p1606_p6 = scmp.lt.s32.totalorder %s1818_s12, 2 }
  0x2b   : > { %s1933_s8 = scalar_select %p24_p2, %s1814_s11, %s26_s22  }
  0x2c   : > { %p35_p8 = por %p34_p4, %p33_p1  ;;  %p2389_p10 = scmp.eq.s32.totalorder %s1867_s13, 1 }
  0x2d   : > { %s123_s18 = sand.u32 1, %s1814_s11   ;;  %s1583_s24 = smul.u32 768, %s1818_s12 }
  0x2e   : > { %p1937_p12 = por %p2389_p10, %p33_p1  ;;  %s1582_s25 = smul.u32 48, %s123_s18 }
  0x2f   : > { %s1946_s27 = scalar_lea.hbm %s2379_s0, %s1583_s24  ;;  %p1948_p11 = pnand %p1606_p6, %p35_p8 }
  0x30   : > { %s127_s22 = scalar_lea.vmem [#allocation2], %s1582_s25  ;;  %s1954_s28 = scalar_lea.sflag [#allocation3], %s123_s18 }
  0x31   : > { %s135_s23 = sshll.u32 %s127_s22, 4  ;;  %s1718_s29 = scalar_lea.hbm %s1946_s27, 768  ;;  %s1952_s23 = int_to_ptr.vmem [resolvable:$true] %s135_s23 }
  0x32   : > { %p1719_p13 = scmp.ne.s32.totalorder %s1946_s27, %s1718_s29  ;;  %p1720_p0 = pneg %p1948_p11 }
  0x33   : > { %s1723_s4 = scalar_lea.hbm %s2379_s0, 1536  ;;  %p1724_p7 = scmp.lt.u32.totalorder %s1946_s27, %s2379_s0 }
  0x34   : > { %p1721_p3 = pnand %p1720_p0, %p1719_p13  ;;  %p1725_p9 = scmp.lt.u32.totalorder %s1723_s4, %s1718_s29 }
  0x35   : > { %p1727_p1 = scmp.lt.u32.totalorder %s1718_s29, %s1946_s27 }
  0x36   : > { %p1722_p5 = pneg %p1721_p3  ;;  %p1726_p2 = por %p1725_p9, %p1724_p7 }
  0x38   : > { %p1728_p4 = por %p1727_p1, %p1726_p2 }
  0x3a   : > { %p1729_p6 = pnand %p1728_p4, %p1722_p5 }
  0x3c   : > { %1732 = shalt.err (!%p1729_p6)
}
  0x3d   : > { %s1733_s7 = scalar_lea.vmem %s1952_s23, 768  ;;  %s1823_s18 = smov [#allocation2]  }
  0x3e   : > { %p1734_p8 = scmp.ne.s32.totalorder %s1952_s23, %s1733_s7  ;;  %s1738_s24 = sshll.u32 %s1823_s18, 4  ;;  %s1739_s24 = int_to_ptr.vmem [resolvable:$false] %s1738_s24 }
  0x3f   : > { %s1740_s25 = scalar_lea.vmem %s1739_s24, 1536  ;;  %p1741_p3 = scmp.lt.s32.totalorder %s1952_s23, %s1739_s24 }
  0x40   : > { %p1736_p10 = pnand %p1734_p8, %p1720_p0  ;;  %p1742_p7 = scmp.lt.s32.totalorder %s1740_s25, %s1733_s7 }
  0x42   : > { %p1737_p13 = pneg %p1736_p10  ;;  %p1743_p9 = por %p1742_p7, %p1741_p3 }
  0x44   : > { %p1744_p2 = pnand %p1743_p9, %p1737_p13 }
  0x46   : > { %1747 = shalt.err (!%p1744_p2)
}
  0x47   : > { %s1824_s20 = smov 64   ;;  %s1825_s26 = smov 4  }
  0x48   : > { %1600 = dma.hbm_to_vmem [thread:$0]  (!%p1948_p11), %s1946_s27, 768, %s1952_s23, %s1954_s28, %s1824_s20, %s1824_s20, %s1825_s26  }
  0x49   : > { %p2392_p0 = scmp.ne.s32.totalorder %s2387_s17, 0 }
  0x4a   : > { %s1985_s22 = sand.u32 (!%p2392_p0), 1, %s1810_s10   ;;  %p2393_p5 = scmp.ne.s32.totalorder (!%p2392_p0), %s2385_s15, 0 }
  0x4b   : > { %147 = sbr.rel (%p2392_p0) target bundleno = 464 (0x1d0), region = 28  ;;  %s150_s30 = scalar_lea.sflag (!%p2392_p0), [#allocation3], %s1985_s22 }
  0x4c   : > { %s1584_s29 = smul.u32 (!%p2392_p0), 48, %s1985_s22 }
  0x4e   : > { %s1989_s3 = scalar_lea.vmem (!%p2392_p0), [#allocation2], %s1584_s29 }
  0x52   : > { %1793 = dma.done.wait (%p2393_p5), %s150_s30, 768  }
  0x53   : > { %1795 = vsyncadd (%p2393_p5), %s150_s30, 4294966528  ;;  %p2394_p11 = scmp.eq.s32.totalorder %s1867_s13, 0 }
  0x55   : > { %1797 = dma.done.wait (%p2394_p11), [#allocation6], 3072   ;;  %p2395_p1 = pmov %p2394_p11 }
  0x56   : > { %v1826_v0 = vmov 0   ;;  %v1650_v1 = vld [vmem:[#allocation5 + $0x44] ss:$8 sps:$4 sm:$0xff]   ;;  %v1654_v3 = vld [vmem:[#allocation5 + $0x40] ss:$8 sps:$4 sm:$0xff]   ;;  %vm361_vm2 = vcmask 523264  }
  0x57   : > { %1799 = vsyncadd (%p2395_p1), [#allocation6], 4294964224  ;;  %406 = vmatprep.mubr.bf16.mxu1 %v1826_v0  ;;  %551 = vmatprep.mubr.bf16.mxu0 %v1826_v0  ;;  %v1652_v2 = vld [vmem:[#allocation5 + $0x4] ss:$8 sps:$4 sm:$0xff]   ;;  %v2001_v4 = vld [vmem:[#allocation5] ss:$8 sps:$4 sm:$0xff]  }
  0x58   : > { %374 = vmatprep.subr.bf16.mxu1 %v1650_v1  ;;  %519 = vmatprep.subr.bf16.mxu0 %v1652_v2  ;;  %v1656_v5 = vld [vmem:[#allocation5 + $0x54] ss:$8 sps:$4 sm:$0xff]   ;;  %v1660_v7 = vld [vmem:[#allocation5 + $0x50] ss:$8 sps:$4 sm:$0xff]   ;;  %v1662_v9 = vld [vmem:[#allocation5 + $0x64] ss:$8 sps:$4 sm:$0xff]  }
  0x59   : > { %375 = vmatpush1.bf16.msra.mxu1 %v1654_v3  ;;  %520 = vmatpush1.bf16.msra.mxu0 %v2001_v4  ;;  %v2004_v6 = vld [vmem:[#allocation5 + $0x14] ss:$8 sps:$4 sm:$0xff]   ;;  %v2006_v8 = vld [vmem:[#allocation5 + $0x10] ss:$8 sps:$4 sm:$0xff]   ;;  %v2009_v10 = vld [vmem:[#allocation5 + $0x24] ss:$8 sps:$4 sm:$0xff]  }
  0x5a   : > { %376 = vmatprep.subr.bf16.mxu1 %v1656_v5  ;;  %521 = vmatprep.subr.bf16.mxu0 %v2004_v6  ;;  %v1666_v11 = vld [vmem:[#allocation5 + $0x60] ss:$8 sps:$4 sm:$0xff]   ;;  %v1668_v13 = vld [vmem:[#allocation5 + $0x74] ss:$8 sps:$4 sm:$0xff]   ;;  %vm201_vm0 = vsmask.f32 3328 }
  0x5b   : > { %v2011_v12 = vld [vmem:[#allocation5 + $0x20] ss:$8 sps:$4 sm:$0xff]   ;;  %v2015_v14 = vld [vmem:[#allocation5 + $0x34] ss:$8 sps:$4 sm:$0xff]   ;;  %v1672_v15 = vld [vmem:[#allocation5 + $0x70] ss:$8 sps:$4 sm:$0xff]  }
  0x5c   : > { %v2017_v16 = vld [vmem:[#allocation5 + $0x30] ss:$8 sps:$4 sm:$0xff]   ;;  %v2021_v18 = vld [vmem:[%s1989_s3 + $0x4] sm:$0xf]  ;;  %vm202_vm1 = vsmask.f32 7440 }
  0x5d   : > { %377 = vmatpush1.bf16.msra.mxu1 %v1660_v7  ;;  %522 = vmatpush1.bf16.msra.mxu0 %v2006_v8  ;;  %v181_v17 = vld [vmem:[%s1989_s3] sm:$0xf]  ;;  %v2024_v19 = vld [vmem:[%s1989_s3 + $0x8] sm:$0x1]  ;;  %v214_v22 = vshll.u32 %v2021_v18, 16  ;;  %v218_v23 = vshrl.u32 %v2021_v18, 16  ;;  %vm2038_vm5 = vmor %vm201_vm0, %vm202_vm1 }
  0x5e   : > { %378 = vmatprep.subr.bf16.mxu1 %v1662_v9  ;;  %523 = vmatprep.subr.bf16.mxu0 %v2009_v10  ;;  %v205_v20 = vshrl.u32 %v181_v17, 16  ;;  %v208_v21 = vshll.u32 %v181_v17, 16  ;;  %v224_v24 = vshll.u32 %v2024_v19, 16  ;;  %v1675_v29 = vld [vmem:[#allocation5 + $0x80] ss:$8 sps:$4 sm:$0xff]   ;;  %vm604_vm3 = vcmask 1042432  }
  0x5f   : > { %v216_v27 = vrot.slane %v214_v22, 5  ;;  %v220_v28 = vrot.slane %v218_v23, 4  ;;  %v1677_v30 = vld [vmem:[#allocation5 + $0x84] ss:$8 sps:$4 sm:$0xff]   ;;  %v1500_v33 = vcombine.low %v181_v17, %v2021_v18  ;;  %v1680_v34 = vld [vmem:[#allocation5 + $0x94] ss:$8 sps:$4 sm:$0xff]   ;;  %v817_v17 = vlaneseq }
  0x60   : > { %v207_v25 = vrot.slane %v205_v20, 4  ;;  %v210_v26 = vrot.slane %v208_v21, 5  ;;  %v226_v32 = vrot.slane %v224_v24, 5  ;;  %v2033_v35 = vld [vmem:[%s1989_s3 + $0xc] sm:$0xf]  ;;  %vm605_vm4 = vcmask 1046532  }
  0x61   : > { %379 = vmatpush1.bf16.msra.mxu1 %v1666_v11  ;;  %524 = vmatpush1.bf16.msra.mxu0 %v2011_v12  ;;  %v221_v37 = vor.u32 %v220_v28, %v216_v27  ;;  %v2043_v38 = vld [vmem:[%s1989_s3 + $0x10] sm:$0xf]  ;;  %v2046_v39 = vld [vmem:[%s1989_s3 + $0x14] sm:$0x1]  ;;  %v229_v40 = vshrl.u32 %v2033_v35, 16  ;;  %v232_v41 = vshll.u32 %v2033_v35, 16  ;;  %vm2080_vm6 = vmor %vm604_vm3, %vm605_vm4 }
  0x62   : > { %380 = vmatprep.subr.bf16.mxu1 %v1668_v13  ;;  %525 = vmatprep.subr.bf16.mxu0 %v2015_v14  ;;  %v211_v31 = vor.u32 %v210_v26, %v207_v25  ;;  %v238_v43 = vshll.u32 %v2043_v38, 16  ;;  %v242_v44 = vshrl.u32 %v2043_v38, 16  ;;  %v248_v45 = vshll.u32 %v2046_v39, 16  ;;  %v1678_v52 = vld [vmem:[#allocation5 + $0x90] ss:$8 sps:$4 sm:$0xff]   ;;  %s1483_s15 = sshll.u32 %s1985_s22, 5 }
  0x63   : > { %v222_v46 = vrot.slane %v221_v37, 4  ;;  %v609_v47 = vrot.slane %v2021_v18, 5  ;;  %v231_v48 = vrot.slane %v229_v40, 4  ;;  %v234_v49 = vrot.slane %v232_v41, 5  ;;  %v1684_v59 = vld [vmem:[#allocation5 + $0xa4] ss:$8 sps:$4 sm:$0xff]  }
  0x64   : > { %v212_v42 = vrot.slane %v211_v31, 4  ;;  %v612_v51 = vrot.slane %v2024_v19, 5  ;;  %v240_v53 = vrot.slane %v238_v43, 5  ;;  %v244_v54 = vrot.slane %v242_v44, 4  ;;  %v2064_v60 = vld [vmem:[%s1989_s3 + $0x18] sm:$0xf] }
  0x65   : > { %381 = vmatpush1.bf16.msra.mxu1 %v1672_v15  ;;  %526 = vmatpush1.bf16.msra.mxu0 %v2017_v16  ;;  %v227_v55 = vsel %vm2038_vm5, %v222_v46, %v226_v32  ;;  %v235_v56 = vor.u32 %v234_v49, %v231_v48  ;;  %v250_v57 = vrot.slane %v248_v45, 5  ;;  %v1501_v58 = vcombine.low %v2033_v35, %v2043_v38  ;;  %v2067_v63 = vld [vmem:[%s1989_s3 + $0x1c] sm:$0xf]  ;;  %v2070_v1 = vld [vmem:[%s1989_s3 + $0x20] sm:$0x1]  ;;  %s2247_s17 = scalar_lea.vmem [#allocation7], %s1483_s15 }
  0x66   : > { %1542 = vmatprep.subr.bf16.mxu1 %v1652_v2  ;;  %708 = vmatprep.subr.bf16.mxu0 %v1677_v30  ;;  %v217_v50 = vsel %vm2038_vm5, %v212_v42, %v216_v27  ;;  %v245_v62 = vor.u32 %v244_v54, %v240_v53  ;;  %v253_v2 = vshrl.u32 %v2064_v60, 16  ;;  %v256_v3 = vshll.u32 %v2064_v60, 16  ;;  %v1682_v7 = vld [vmem:[#allocation5 + $0xa0] ss:$8 sps:$4 sm:$0xff]   ;;  %v2086_v22 = vld [vmem:[%s1989_s3 + $0x24] sm:$0xf] }
  0x67   : > { %v1484_v61 = vcombine.low %v217_v50, %v227_v55  ;;  %v236_v5 = vrot.slane %v235_v56, 4  ;;  %v262_v9 = vshll.u32 %v2067_v63, 16  ;;  %v266_v11 = vshrl.u32 %v2067_v63, 16  ;;  %v592_v15 = vld [vmem:[%s1989_s3] sm:$0xe]  ;;  %s1541_s27 = sshll.u32 %s1867_s13, 9 }
  0x68   : > { %1512 = vmatmul.mubr.msk.bf16.vlgmr.msra.gmra.mrb[0].mxu0 %vm361_vm2, %v1500_v33  ;;  %v272_v13 = vshll.u32 %v2070_v1, 16  ;;  %v246_v18 = vrot.slane %v245_v62, 4  ;;  %v255_v19 = vrot.slane %v253_v2, 4  ;;  %v258_v20 = vrot.slane %v256_v3, 5  ;;  %v2092_v27 = vld [vmem:[%s1989_s3 + $0x28] sm:$0xf]  ;;  %s2331_s4 = scalar_lea.hbm %s2381_s2, %s1541_s27 }
  0x69   : > { %709 = vmatpush1.bf16.msra.mxu0 %v1675_v29  ;;  %561 = vmatprep.mubr.bf16.mxu0 %v1826_v0  ;;  %v1516_v21 = vrot.slane %v592_v15, 9  ;;  %v241_v23 = vsel %vm2038_vm5, %v236_v5, %v240_v53  ;;  %v264_v24 = vrot.slane %v262_v9, 5  ;;  %v268_v25 = vrot.slane %v266_v11, 4  ;;  %v1687_v29 = vld [vmem:[#allocation5 + $0xb4] ss:$8 sps:$4 sm:$0xff]   ;;  %s1391_s19 = sshll.u32 %s2247_s17, 4  ;;  %s2333_s19 = int_to_ptr.vmem [resolvable:$true] %s1391_s19 }
  0x6a   : > { %710 = vmatprep.subr.bf16.mxu0 %v1680_v34  ;;  %1496 = vmatmul.mubr.msk.bf16.vlgmr.msra.gmra.mrb[0].mxu1 %vm361_vm2, %v1484_v61  ;;  %v274_v26 = vrot.slane %v272_v13, 5  ;;  %v251_v28 = vsel %vm2038_vm5, %v246_v18, %v250_v57  ;;  %v259_v30 = vor.u32 %v258_v20, %v255_v19  ;;  %v611_v31 = vrot.slane %v609_v47, 4  ;;  %v1685_v37 = vld [vmem:[#allocation5 + $0xb0] ss:$8 sps:$4 sm:$0xff]   ;;  %v200_v44 = vld [vmem:[%s1989_s3 + $0x2c] sm:$0x1] }
  0x6b   : > { %1546 = vmatpush1.bf16.msra.mxu1 %v2001_v4  ;;  %416 = vmatprep.mubr.bf16.mxu1 %v1826_v0  ;;  %v610_v4 = vsel %vm2080_vm6, %v1516_v21, %v609_v47  ;;  %v1485_v32 = vcombine.low %v241_v23, %v251_v28  ;;  %v269_v33 = vor.u32 %v268_v25, %v264_v24  ;;  %v277_v34 = vshrl.u32 %v2086_v22, 16  ;;  %v593_v49 = vld [vmem:[%s1989_s3 + $0xc] sm:$0xe]  ;;  %v594_v3 = vld [vmem:[%s1989_s3 + $0x18] sm:$0xe]  ;;  %s1378_s5 = scalar_lea.sflag [#allocation4], %s1985_s22 }
  0x6c   : > { %1543 = vmatprep.subr.bf16.mxu1 %v2004_v6  ;;  %v280_v35 = vshll.u32 %v2086_v22, 16  ;;  %v260_v40 = vrot.slane %v259_v30, 4  ;;  %v613_v6 = vsel %vm2080_vm6, %v611_v31, %v612_v51  ;;  %v286_v41 = vshll.u32 %v2092_v27, 16  ;;  %v595_v19 = vld [vmem:[%s1989_s3 + $0x24] sm:$0xe]  ;;  %s1748_s6 = scalar_lea.vmem %s2333_s19, 512 }
  0x6d   : > { %711 = vmatpush1.bf16.msra.mxu0 %v1678_v52  ;;  %v290_v42 = vshrl.u32 %v2092_v27, 16  ;;  %v270_v43 = vrot.slane %v269_v33, 4  ;;  %v279_v45 = vrot.slane %v277_v34, 4  ;;  %v1520_v50 = vcombine.low %v610_v4, %v613_v6  ;;  %p1749_p4 = scmp.ne.s32.totalorder %s2333_s19, %s1748_s6  ;;  %s1828_s13 = smov [#allocation7]  }
  0x6e   : > { %712 = vmatprep.subr.bf16.mxu0 %v1684_v59  ;;  %v282_v46 = vrot.slane %v280_v35, 5  ;;  %v288_v47 = vrot.slane %v286_v41, 5  ;;  %v616_v51 = vrot.slane %v2043_v38, 5  ;;  %v296_v54 = vshll.u32 %v200_v44, 16  ;;  %s1752_s7 = sshll.u32 %s1828_s13, 4  ;;  %s1753_s7 = int_to_ptr.vmem [resolvable:$false] %s1752_s7 }
  0x6f   : > { %1547 = vmatpush1.bf16.msra.mxu1 %v2006_v8  ;;  %v292_v48 = vrot.slane %v290_v42, 4  ;;  %v265_v8 = vsel %vm2038_vm5, %v260_v40, %v264_v24  ;;  %v275_v52 = vsel %vm2038_vm5, %v270_v43, %v274_v26  ;;  %v1517_v56 = vrot.slane %v593_v49, 9  ;;  %p1750_p6 = pnand %p1749_p4, %p1937_p12  ;;  %s1754_s18 = scalar_lea.vmem %s1753_s7, 1024 }
  0x70   : > { %1513 = vmatmul.mubr.msk.bf16.gmra.mrb[4].mxu0 %vm361_vm2, %v1501_v58  ;;  %1544 = vmatprep.subr.bf16.mxu1 %v2009_v10  ;;  %v283_v53 = vor.u32 %v282_v46, %v279_v45  ;;  %v618_v10 = vrot.slane %v616_v51, 4  ;;  %v619_v57 = vrot.slane %v2046_v39, 5  ;;  %v1486_v38 = vcombine.low %v265_v8, %v275_v52  ;;  %p1755_p10 = scmp.lt.s32.totalorder %s2333_s19, %s1753_s7  ;;  %p1756_p13 = scmp.lt.s32.totalorder %s1754_s18, %s1748_s6 }
  0x71   : > { %713 = vmatpush1.bf16.msra.mxu0 %v1682_v7  ;;  %740 = vmatprep.mubr.bf16.mxu0 %v1826_v0  ;;  %v293_v55 = vor.u32 %v292_v48, %v288_v47  ;;  %v298_v59 = vrot.slane %v296_v54, 5  ;;  %v617_v62 = vsel %vm2080_vm6, %v1517_v56, %v616_v51  ;;  %v623_v39 = vrot.slane %v2067_v63, 5  ;;  %p1751_p8 = pneg %p1750_p6 }
  0x72   : > { %714 = vmatprep.subr.bf16.mxu0 %v1687_v29  ;;  %1497 = vmatmul.mubr.msk.bf16.gmra.mrb[4].mxu1 %vm361_vm2, %v1485_v32  ;;  %v284_v58 = vrot.slane %v283_v53, 4  ;;  %v620_v2 = vsel %vm2080_vm6, %v618_v10, %v619_v57  ;;  %v626_v11 = vrot.slane %v2070_v1, 5  ;;  %v630_v18 = vrot.slane %v2092_v27, 5  ;;  %p1757_p3 = por %p1756_p13, %p1755_p10 }
  0x73   : > { %426 = vmatprep.mubr.bf16.mxu1 %v1826_v0  ;;  %1548 = vmatpush1.bf16.msra.mxu1 %v2011_v12  ;;  %v294_v61 = vrot.slane %v293_v55, 4  ;;  %v1521_v12 = vcombine.low %v617_v62, %v620_v2  ;;  %v625_v9 = vrot.slane %v623_v39, 4  ;;  %v1519_v1 = vrot.slane %v595_v19, 9 }
  0x74   : > { %1545 = vmatprep.subr.bf16.mxu1 %v2015_v14  ;;  %v1518_v14 = vrot.slane %v594_v3, 9  ;;  %v289_v5 = vsel %vm2038_vm5, %v284_v58, %v288_v47  ;;  %v632_v20 = vrot.slane %v630_v18, 4  ;;  %v633_v21 = vrot.slane %v200_v44, 5  ;;  %p1758_p7 = pnand %p1757_p3, %p1751_p8 }
  0x75   : > { %715 = vmatpush1.bf16.msra.mxu0 %v1685_v37  ;;  %v299_v7 = vsel %vm2038_vm5, %v294_v61, %v298_v59  ;;  %v627_v15 = vsel %vm2080_vm6, %v625_v9, %v626_v11  ;;  %v1502_v23 = vcombine.low %v2064_v60, %v2067_v63  ;;  %v631_v24 = vsel %vm2080_vm6, %v1519_v1, %v630_v18 }
  0x76   : > { %v1487_v13 = vcombine.low %v289_v5, %v299_v7  ;;  %v634_v25 = vsel %vm2080_vm6, %v632_v20, %v633_v21  ;;  %v1503_v28 = vcombine.low %v2086_v22, %v2092_v27  ;;  %v1827_v4 = vmov 1983009808  }
  0x77   : > { %1549 = vmatpush1.bf16.msra.mxu1 %v2017_v16  ;;  %v624_v16 = vsel %vm2080_vm6, %v1518_v14, %v623_v39  ;;  %v1523_v26 = vcombine.low %v631_v24, %v634_v25  ;;  %v815_v31 = vunpack.c.l.s4 %v1827_v4  ;;  %v818_v35 = vshrl.u32 %v817_v17, 7 }
  0x78   : > { %1532 = vmatmul.mubr.msk.bf16.vlgmr.msra.gmra.mrb[0].mxu0 %vm361_vm2, %v1520_v50  ;;  %v1522_v36 = vcombine.low %v624_v16, %v627_v15  ;;  %vm981_vm7 = vcmask 1041408   ;;  %vm1334_vm8 = vcmask 1041409   ;;  %vm1336_vm9 = vcmask 1042434  }
  0x79   : > { %750 = vmatprep.mubr.bf16.mxu0 %v1826_v0  ;;  %vm1338_vm10 = vcmask 1043459   ;;  %vm1340_vm11 = vcmask 1044484   ;;  %vm1342_vm13 = vcmask 1045509   ;;  %vm1344_vm14 = vcmask 1046534  }
  0x7a   : > { %1498 = vmatmul.mubr.msk.bf16.gmra.mrb[8].mxu1 %vm361_vm2, %v1486_v38  ;;  %vm1346_vm1 = vcmask 1047559  }
  0x7b   : > { %436 = vmatprep.mubr.bf16.mxu1 %v1826_v0 }
  0x80   : > { %1533 = vmatmul.mubr.msk.bf16.gmra.mrb[4].mxu0 %vm361_vm2, %v1521_v12 }
  0x81   : > { %760 = vmatprep.mubr.bf16.mxu0 %v1826_v0 }
  0x82   : > { %1499 = vmatmul.mubr.msk.bf16.gmra.mrb[12].mxu1 %vm361_vm2, %v1487_v13 }
  0x83   : > { %571 = vmatprep.mubr.bf16.mxu1 %v1826_v0 }
  0x88   : > { %1534 = vmatmul.mubr.msk.bf16.gmra.mrb[8].mxu0 %vm361_vm2, %v1522_v36 }
  0x89   : > { %770 = vmatprep.mubr.bf16.mxu0 %v1826_v0 }
  0x8a   : > { %1514 = vmatmul.mubr.msk.bf16.vlgmr.msra.gmra.mrb[8].mxu1 %vm361_vm2, %v1502_v23 }
  0x8b   : > { %581 = vmatprep.mubr.bf16.mxu1 %v1826_v0  ;;  %v816_v0 = vunpack.c.0.s8 %v815_v31 }
  0x8d   : > { %v2168_v41 = vsub.s32 %v816_v0, %v818_v35 }
  0x90   : > { %1535 = vmatmul.mubr.msk.bf16.gmra.mrb[12].mxu0 %vm361_vm2, %v1523_v26 }
  0x92   : > { %1515 = vmatmul.mubr.msk.bf16.gmra.mrb[12].mxu1 %vm361_vm2, %v1503_v28 }
 0x13d   : > { %v408_v60 = vpop.f32.mrb[0].mxu1 }
 0x13e   : > { %v410_v63 = vpop.f32.mrb[1].mxu1 }
 0x13f   : > { %v412_v29 = vpop.f32.mrb[2].mxu1 }
 0x140   : > { %v414_v30 = vpop.f32.mrb[3].mxu1 }
 0x145   : > { %v418_v32 = vpop.f32.mrb[4].mxu1 }
 0x146   : > { %v2162_v33 = vpop.f32.mrb[5].mxu1 }
 0x147   : > { %v2164_v34 = vpop.f32.mrb[6].mxu1 }
 0x148   : > { %v2166_v37 = vpop.f32.mrb[7].mxu1 }
 0x14b   : > { %v742_v22 = vpop.f32.mrb[0].mxu0 }
 0x14c   : > { %v1550_v27 = vadd.f32 %v742_v22, %v408_v60  ;;  %v744_v40 = vpop.f32.mrb[1].mxu0 }
 0x14d   : > { %v1551_v6 = vadd.f32 %v744_v40, %v410_v63  ;;  %v746_v42 = vpop.f32.mrb[2].mxu0 }
 0x14e   : > { %v1552_v43 = vadd.f32 %v746_v42, %v412_v29  ;;  %v748_v44 = vpop.f32.mrb[3].mxu0 }
 0x14f   : > { %v797_v45 = vmax.f32 %v1550_v27, %v1551_v6  ;;  %v1553_v46 = vadd.f32 %v748_v44, %v414_v30 }
 0x151   : > { %v813_v47 = vcombine.high %v797_v45, %v797_v45  ;;  %v820_v48 = vrot.slane %v797_v45, %v2168_v41  ;;  %v798_v49 = vmax.f32 %v1552_v43, %v1553_v46 }
 0x153   : > { %v827_v50 = vrot.slane %v813_v47, %v2168_v41  ;;  %v828_v51 = vcombine.high %v820_v48, %v820_v48  ;;  %v982_v8 = vsel %vm981_vm7, %v820_v48, -inf  ;;  %v830_v52 = vcombine.high %v798_v49, %v798_v49  ;;  %v752_v53 = vpop.f32.mrb[4].mxu0 }
 0x154   : > { %v983_v54 = vrot.slane %v982_v8, 4  ;;  %v837_v55 = vrot.slane %v798_v49, %v2168_v41  ;;  %v2174_v56 = vadd.f32 %v752_v53, %v418_v32  ;;  %v2176_v10 = vpop.f32.mrb[5].mxu0 }
 0x155   : > { %v829_v57 = vcombine.high %v827_v50, %v827_v50  ;;  %v989_v38 = vsel %vm981_vm7, %v828_v51, -inf  ;;  %v996_v58 = vsel %vm981_vm7, %v827_v50, -inf  ;;  %v844_v59 = vrot.slane %v830_v52, %v2168_v41  ;;  %v2181_v61 = vpop.f32.mrb[6].mxu0 }
 0x156   : > { %v984_v62 = vmax.f32 %v982_v8, %v983_v54  ;;  %v990_v2 = vrot.slane %v989_v38, 4  ;;  %v997_v3 = vrot.slane %v996_v58, 4  ;;  %v845_v39 = vcombine.high %v837_v55, %v837_v55  ;;  %v2183_v12 = vpop.f32.mrb[7].mxu0 }
 0x157   : > { %v1003_v14 = vsel %vm981_vm7, %v829_v57, -inf  ;;  %v846_v5 = vcombine.high %v844_v59, %v844_v59  ;;  %v1010_v7 = vsel %vm981_vm7, %v837_v55, -inf  ;;  %v1024_v9 = vsel %vm981_vm7, %v844_v59, -inf }
 0x158   : > { %v985_v11 = vrot.slane %v984_v62, 2  ;;  %v991_v13 = vmax.f32 %v989_v38, %v990_v2  ;;  %v998_v16 = vmax.f32 %v996_v58, %v997_v3  ;;  %v1004_v15 = vrot.slane %v1003_v14, 4 }
 0x159   : > { %v1011_v18 = vrot.slane %v1010_v7, 4  ;;  %v1017_v19 = vsel %vm981_vm7, %v845_v39, -inf  ;;  %v1025_v36 = vrot.slane %v1024_v9, 4  ;;  %v1031_v1 = vsel %vm981_vm7, %v846_v5, -inf }
 0x15a   : > { %v986_v20 = vmax.f32 %v984_v62, %v985_v11  ;;  %v992_v21 = vrot.slane %v991_v13, 2  ;;  %v999_v23 = vrot.slane %v998_v16, 2  ;;  %v1005_v24 = vmax.f32 %v1003_v14, %v1004_v15 }
 0x15b   : > { %v1012_v25 = vmax.f32 %v1010_v7, %v1011_v18  ;;  %v1018_v26 = vrot.slane %v1017_v19, 4  ;;  %v1026_v28 = vmax.f32 %v1024_v9, %v1025_v36  ;;  %v1032_v60 = vrot.slane %v1031_v1, 4  ;;  %v2190_v63 = vpop.f32.mrb[8].mxu0 }
 0x15c   : > { %v987_v29 = vrot.slane %v986_v20, 1  ;;  %v993_v30 = vmax.f32 %v991_v13, %v992_v21  ;;  %v1000_v4 = vmax.f32 %v998_v16, %v999_v23  ;;  %v1006_v31 = vrot.slane %v1005_v24, 2  ;;  %v2192_v17 = vpop.f32.mrb[9].mxu0 }
 0x15d   : > { %v1013_v32 = vrot.slane %v1012_v25, 2  ;;  %v1019_v0 = vmax.f32 %v1017_v19, %v1018_v26  ;;  %v1027_v35 = vrot.slane %v1026_v28, 2  ;;  %v1033_v22 = vmax.f32 %v1031_v1, %v1032_v60  ;;  %v2194_v27 = vpop.f32.mrb[10].mxu0  ;;  %v573_v49 = vpop.f32.mrb[8].mxu1 }
 0x15e   : > { %v988_v40 = vmax.f32 %v986_v20, %v987_v29  ;;  %v994_v6 = vrot.slane %v993_v30, 1  ;;  %v1001_v42 = vrot.slane %v1000_v4, 1  ;;  %v1007_v43 = vmax.f32 %v1005_v24, %v1006_v31  ;;  %v2196_v44 = vpop.f32.mrb[11].mxu0  ;;  %v575_v52 = vpop.f32.mrb[9].mxu1 }
 0x15f   : > { %v1014_v45 = vmax.f32 %v1012_v25, %v1013_v32  ;;  %v1020_v46 = vrot.slane %v1019_v0, 2  ;;  %v1028_v47 = vmax.f32 %v1026_v28, %v1027_v35  ;;  %v1034_v48 = vrot.slane %v1033_v22, 2  ;;  %v577_v38 = vpop.f32.mrb[10].mxu1 }
 0x160   : > { %v995_v50 = vmax.f32 %v993_v30, %v994_v6  ;;  %v1002_v51 = vmax.f32 %v1000_v4, %v1001_v42  ;;  %v1008_v8 = vrot.slane %v1007_v43, 1  ;;  %vm1206_vm12 = vcmp.gt.f32.partialorder %v988_v40, 0.0  ;;  %v2198_v62 = vpop.f32.mrb[11].mxu1 }
 0x161   : > { %v1238_v53 = vmul.f32 0.01, %v988_v40  ;;  %v1015_v54 = vrot.slane %v1014_v45, 1  ;;  %v1021_v55 = vmax.f32 %v1019_v0, %v1020_v46  ;;  %v1029_v57 = vrot.slane %v1028_v47, 1 }
 0x162   : > { %v1009_v58 = vmax.f32 %v1007_v43, %v1008_v8  ;;  %vm1207_vm15 = vcmp.gt.f32.partialorder %v995_v50, 0.0  ;;  %vm1208_vm0 = vcmp.gt.f32.partialorder %v1002_v51, 0.0  ;;  %v1239_v59 = vmul.f32 0.01, %v995_v50 }
 0x163   : > { %v1240_v2 = vmul.f32 0.01, %v1002_v51  ;;  %v1270_v3 = vsel %vm1206_vm12, %v988_v40, %v1238_v53  ;;  %v1016_v39 = vmax.f32 %v1014_v45, %v1015_v54  ;;  %v1022_v14 = vrot.slane %v1021_v55, 1  ;;  %v2200_v5 = vpop.f32.mrb[12].mxu0 }
 0x164   : > { %vm1209_vm2 = vcmp.gt.f32.partialorder %v1009_v58, 0.0  ;;  %v1241_v7 = vmul.f32 0.01, %v1009_v58  ;;  %v1271_v9 = vsel %vm1207_vm15, %v995_v50, %v1239_v59  ;;  %v1030_v11 = vmax.f32 %v1028_v47, %v1029_v57  ;;  %v2202_v13 = vpop.f32.mrb[13].mxu0 }
 0x165   : > { %v1272_v16 = vsel %vm1208_vm0, %v1002_v51, %v1240_v2  ;;  %v1335_v15 = vsel %vm1334_vm8, %v1271_v9, %v1270_v3  ;;  %v1023_v18 = vmax.f32 %v1021_v55, %v1022_v14  ;;  %v1035_v19 = vmax.f32 %v1033_v22, %v1034_v48  ;;  %v2205_v36 = vpop.f32.mrb[14].mxu0  ;;  %v2215_v30 = vpop.f32.mrb[12].mxu1 }
 0x166   : > { %v1273_v1 = vsel %vm1209_vm2, %v1009_v58, %v1241_v7  ;;  %v1337_v20 = vsel %vm1336_vm9, %v1272_v16, %v1335_v15  ;;  %vm1210_vm3 = vcmp.gt.f32.partialorder %v1016_v39, 0.0  ;;  %vm1212_vm4 = vcmp.gt.f32.partialorder %v1030_v11, 0.0  ;;  %v2208_v21 = vpop.f32.mrb[15].mxu0  ;;  %v2219_v35 = vpop.f32.mrb[13].mxu1 }
 0x167   : > { %v1036_v23 = vrot.slane %v1035_v19, 1  ;;  %vm1211_vm5 = vcmp.gt.f32.partialorder %v1023_v18, 0.0  ;;  %v1242_v24 = vmul.f32 0.01, %v1016_v39  ;;  %v1243_v25 = vmul.f32 0.01, %v1023_v18 }
 0x168   : > { %v1244_v26 = vmul.f32 0.01, %v1030_v11  ;;  %v1339_v28 = vsel %vm1338_vm10, %v1273_v1, %v1337_v20  ;;  %v1555_v60 = vadd.f32 %v2176_v10, %v2162_v33  ;;  %v1556_v29 = vadd.f32 %v2181_v61, %v2164_v34  ;;  %v2228_v34 = vpop.f32.mrb[14].mxu1 }
 0x169   : > { %v1037_v4 = vmax.f32 %v1035_v19, %v1036_v23  ;;  %v1274_v31 = vsel %vm1210_vm3, %v1016_v39, %v1242_v24  ;;  %v1275_v32 = vsel %vm1211_vm5, %v1023_v18, %v1243_v25  ;;  %v1557_v0 = vadd.f32 %v2183_v12, %v2166_v37  ;;  %v2231_v37 = vpop.f32.mrb[15].mxu1 }
 0x16a   : > { %v1276_v22 = vsel %vm1212_vm4, %v1030_v11, %v1244_v26  ;;  %v1341_v40 = vsel %vm1340_vm11, %v1274_v31, %v1339_v28  ;;  %v799_v33 = vmax.f32 %v2174_v56, %v1555_v60  ;;  %v2226_v10 = vadd.f32 %v2190_v63, %v573_v49 }
 0x16b   : > { %vm1213_vm6 = vcmp.gt.f32.partialorder %v1037_v4, 0.0  ;;  %v1245_v61 = vmul.f32 0.01, %v1037_v4  ;;  %v1343_v6 = vsel %vm1342_vm13, %v1275_v32, %v1341_v40  ;;  %v800_v42 = vmax.f32 %v1556_v29, %v1557_v0 }
 0x16c   : > { %v1345_v12 = vsel %vm1344_vm14, %v1276_v22, %v1343_v6  ;;  %v847_v43 = vcombine.high %v799_v33, %v799_v33  ;;  %v854_v45 = vrot.slane %v799_v33, %v2168_v41  ;;  %v2236_v46 = vadd.f32 %v2192_v17, %v575_v52 }
 0x16d   : > { %v1277_v56 = vsel %vm1213_vm6, %v1037_v4, %v1245_v61  ;;  %v864_v63 = vcombine.high %v800_v42, %v800_v42  ;;  %v871_v47 = vrot.slane %v800_v42, %v2168_v41  ;;  %v2240_v48 = vadd.f32 %v2194_v27, %v577_v38 }
 0x16e   : > { %v1347_v49 = vsel %vm1346_vm1, %v1277_v56, %v1345_v12  ;;  %v861_v50 = vrot.slane %v847_v43, %v2168_v41  ;;  %v862_v51 = vcombine.high %v854_v45, %v854_v45  ;;  %v1038_v8 = vsel %vm981_vm7, %v854_v45, -inf }
 0x16f   : > { %v1039_v53 = vrot.slane %v1038_v8, 4  ;;  %v878_v54 = vrot.slane %v864_v63, %v2168_v41  ;;  %v879_v55 = vcombine.high %v871_v47, %v871_v47  ;;  %v1066_v17 = vsel %vm981_vm7, %v871_v47, -inf  ;;  %1373 = vst [vmem:[%s2247_s17] sm:$0xff] %v1347_v49 }
 0x170   : > { %v863_v52 = vcombine.high %v861_v50, %v861_v50  ;;  %v1045_v27 = vsel %vm981_vm7, %v862_v51, -inf  ;;  %v1052_v57 = vsel %vm981_vm7, %v861_v50, -inf  ;;  %v1067_v38 = vrot.slane %v1066_v17, 4 }
 0x171   : > { %v1040_v58 = vmax.f32 %v1038_v8, %v1039_v53  ;;  %v1046_v59 = vrot.slane %v1045_v27, 4  ;;  %v1053_v2 = vrot.slane %v1052_v57, 4  ;;  %v880_v3 = vcombine.high %v878_v54, %v878_v54 }
 0x172   : > { %v1059_v39 = vsel %vm981_vm7, %v863_v52, -inf  ;;  %v1068_v14 = vmax.f32 %v1066_v17, %v1067_v38  ;;  %v1073_v7 = vsel %vm981_vm7, %v879_v55, -inf  ;;  %v1080_v9 = vsel %vm981_vm7, %v878_v54, -inf }
 0x173   : > { %v1041_v11 = vrot.slane %v1040_v58, 2  ;;  %v1047_v16 = vmax.f32 %v1045_v27, %v1046_v59  ;;  %v1054_v15 = vmax.f32 %v1052_v57, %v1053_v2  ;;  %v1060_v18 = vrot.slane %v1059_v39, 4 }
 0x174   : > { %v1069_v19 = vrot.slane %v1068_v14, 2  ;;  %v1074_v1 = vrot.slane %v1073_v7, 4  ;;  %v1081_v20 = vrot.slane %v1080_v9, 4  ;;  %v1087_v23 = vsel %vm981_vm7, %v880_v3, -inf }
 0x175   : > { %v1042_v24 = vmax.f32 %v1040_v58, %v1041_v11  ;;  %v1048_v25 = vrot.slane %v1047_v16, 2  ;;  %v1055_v26 = vrot.slane %v1054_v15, 2  ;;  %v1061_v28 = vmax.f32 %v1059_v39, %v1060_v18 }
 0x176   : > { %v1070_v60 = vmax.f32 %v1068_v14, %v1069_v19  ;;  %v1075_v29 = vmax.f32 %v1073_v7, %v1074_v1  ;;  %v1082_v4 = vmax.f32 %v1080_v9, %v1081_v20  ;;  %v1088_v31 = vrot.slane %v1087_v23, 4 }
 0x177   : > { %v1043_v32 = vrot.slane %v1042_v24, 1  ;;  %v1049_v0 = vmax.f32 %v1047_v16, %v1048_v25  ;;  %v1056_v22 = vmax.f32 %v1054_v15, %v1055_v26  ;;  %v1062_v40 = vrot.slane %v1061_v28, 2 }
 0x178   : > { %v1071_v33 = vrot.slane %v1070_v60, 1  ;;  %v1076_v61 = vrot.slane %v1075_v29, 2  ;;  %v1083_v6 = vrot.slane %v1082_v4, 2  ;;  %v1089_v42 = vmax.f32 %v1087_v23, %v1088_v31 }
 0x179   : > { %v1044_v12 = vmax.f32 %v1042_v24, %v1043_v32  ;;  %v1050_v43 = vrot.slane %v1049_v0, 1  ;;  %v1057_v45 = vrot.slane %v1056_v22, 1  ;;  %v1063_v56 = vmax.f32 %v1061_v28, %v1062_v40 }
 0x17a   : > { %v1072_v63 = vmax.f32 %v1070_v60, %v1071_v33  ;;  %v1077_v47 = vmax.f32 %v1075_v29, %v1076_v61  ;;  %v1084_v49 = vmax.f32 %v1082_v4, %v1083_v6  ;;  %v1090_v50 = vrot.slane %v1089_v42, 2 }
 0x17b   : > { %v1051_v51 = vmax.f32 %v1049_v0, %v1050_v43  ;;  %v1058_v8 = vmax.f32 %v1056_v22, %v1057_v45  ;;  %v1064_v53 = vrot.slane %v1063_v56, 1  ;;  %vm1214_vm12 = vcmp.gt.f32.partialorder %v1044_v12, 0.0 }
 0x17c   : > { %v1246_v54 = vmul.f32 0.01, %v1044_v12  ;;  %v1078_v55 = vrot.slane %v1077_v47, 1  ;;  %v1085_v17 = vrot.slane %v1084_v49, 1  ;;  %v1091_v52 = vmax.f32 %v1089_v42, %v1090_v50 }
 0x17d   : > { %v1065_v27 = vmax.f32 %v1063_v56, %v1064_v53  ;;  %vm1215_vm15 = vcmp.gt.f32.partialorder %v1051_v51, 0.0  ;;  %vm1216_vm0 = vcmp.gt.f32.partialorder %v1058_v8, 0.0  ;;  %v1247_v57 = vmul.f32 0.01, %v1051_v51 }
 0x17e   : > { %v1248_v38 = vmul.f32 0.01, %v1058_v8  ;;  %v1278_v58 = vsel %vm1214_vm12, %v1044_v12, %v1246_v54  ;;  %v1079_v59 = vmax.f32 %v1077_v47, %v1078_v55  ;;  %v1086_v2 = vmax.f32 %v1084_v49, %v1085_v17 }
 0x17f   : > { %vm1217_vm2 = vcmp.gt.f32.partialorder %v1065_v27, 0.0  ;;  %v1249_v3 = vmul.f32 0.01, %v1065_v27  ;;  %v1279_v39 = vsel %vm1215_vm15, %v1051_v51, %v1247_v57  ;;  %v1092_v14 = vrot.slane %v1091_v52, 1 }
 0x180   : > { %v1280_v7 = vsel %vm1216_vm0, %v1058_v8, %v1248_v38  ;;  %v1348_v9 = vsel %vm1334_vm8, %v1279_v39, %v1278_v58  ;;  %vm1218_vm3 = vcmp.gt.f32.partialorder %v1072_v63, 0.0  ;;  %vm1219_vm4 = vcmp.gt.f32.partialorder %v1079_v59, 0.0 }
 0x181   : > { %v1281_v11 = vsel %vm1217_vm2, %v1065_v27, %v1249_v3  ;;  %v1349_v16 = vsel %vm1336_vm9, %v1280_v7, %v1348_v9  ;;  %v1093_v15 = vmax.f32 %v1091_v52, %v1092_v14  ;;  %vm1220_vm5 = vcmp.gt.f32.partialorder %v1086_v2, 0.0 }
 0x182   : > { %v1250_v18 = vmul.f32 0.01, %v1072_v63  ;;  %v1251_v19 = vmul.f32 0.01, %v1079_v59  ;;  %v1252_v1 = vmul.f32 0.01, %v1086_v2  ;;  %v1350_v20 = vsel %vm1338_vm10, %v1281_v11, %v1349_v16 }
 0x183   : > { %vm1221_vm6 = vcmp.gt.f32.partialorder %v1093_v15, 0.0  ;;  %v1253_v23 = vmul.f32 0.01, %v1093_v15  ;;  %v801_v24 = vmax.f32 %v2226_v10, %v2236_v46  ;;  %v1561_v25 = vadd.f32 %v2196_v44, %v2198_v62 }
 0x184   : > { %v1282_v26 = vsel %vm1218_vm3, %v1072_v63, %v1250_v18  ;;  %v1283_v28 = vsel %vm1219_vm4, %v1079_v59, %v1251_v19  ;;  %v1284_v60 = vsel %vm1220_vm5, %v1086_v2, %v1252_v1  ;;  %v1562_v29 = vadd.f32 %v2200_v5, %v2215_v30 }
 0x185   : > { %v1285_v4 = vsel %vm1221_vm6, %v1093_v15, %v1253_v23  ;;  %v1351_v31 = vsel %vm1340_vm11, %v1282_v26, %v1350_v20  ;;  %v881_v32 = vcombine.high %v801_v24, %v801_v24  ;;  %v888_v0 = vrot.slane %v801_v24, %v2168_v41 }
 0x186   : > { %v1352_v22 = vsel %vm1342_vm13, %v1283_v28, %v1351_v31  ;;  %v802_v10 = vmax.f32 %v2240_v48, %v1561_v25  ;;  %v1563_v44 = vadd.f32 %v2202_v13, %v2219_v35  ;;  %v2273_v62 = vadd.f32 %v2205_v36, %v2228_v34 }
 0x187   : > { %v1353_v5 = vsel %vm1344_vm14, %v1284_v60, %v1352_v22  ;;  %v895_v30 = vrot.slane %v881_v32, %v2168_v41  ;;  %v896_v46 = vcombine.high %v888_v0, %v888_v0  ;;  %v1094_v40 = vsel %vm981_vm7, %v888_v0, -inf }
 0x188   : > { %v1354_v33 = vsel %vm1346_vm1, %v1285_v4, %v1353_v5  ;;  %v1095_v61 = vrot.slane %v1094_v40, 4  ;;  %v898_v6 = vcombine.high %v802_v10, %v802_v10  ;;  %v905_v48 = vrot.slane %v802_v10, %v2168_v41 }
 0x189   : > { %v897_v42 = vcombine.high %v895_v30, %v895_v30  ;;  %v1101_v13 = vsel %vm981_vm7, %v896_v46, -inf  ;;  %v1108_v35 = vsel %vm981_vm7, %v895_v30, -inf  ;;  %v2282_v36 = vmax.f32 %v1562_v29, %v1563_v44  ;;  %1374 = vst [vmem:[%s2247_s17 + $0x8] sm:$0xff] %v1354_v33 }
 0x18a   : > { %v1096_v34 = vmax.f32 %v1094_v40, %v1095_v61  ;;  %v1102_v12 = vrot.slane %v1101_v13, 4  ;;  %v1109_v43 = vrot.slane %v1108_v35, 4  ;;  %v912_v45 = vrot.slane %v898_v6, %v2168_v41 }
 0x18b   : > { %v1115_v56 = vsel %vm981_vm7, %v897_v42, -inf  ;;  %v913_v63 = vcombine.high %v905_v48, %v905_v48  ;;  %v1122_v47 = vsel %vm981_vm7, %v905_v48, -inf  ;;  %v915_v49 = vcombine.high %v2282_v36, %v2282_v36 }
 0x18c   : > { %v1097_v50 = vrot.slane %v1096_v34, 2  ;;  %v1103_v51 = vmax.f32 %v1101_v13, %v1102_v12  ;;  %v1110_v8 = vmax.f32 %v1108_v35, %v1109_v43  ;;  %v1116_v53 = vrot.slane %v1115_v56, 4 }
 0x18d   : > { %v914_v54 = vcombine.high %v912_v45, %v912_v45  ;;  %v1123_v55 = vrot.slane %v1122_v47, 4  ;;  %v1129_v17 = vsel %vm981_vm7, %v913_v63, -inf  ;;  %v1136_v52 = vsel %vm981_vm7, %v912_v45, -inf }
 0x18e   : > { %v1098_v27 = vmax.f32 %v1096_v34, %v1097_v50  ;;  %v1104_v57 = vrot.slane %v1103_v51, 2  ;;  %v1111_v38 = vrot.slane %v1110_v8, 2  ;;  %v1117_v58 = vmax.f32 %v1115_v56, %v1116_v53 }
 0x18f   : > { %v1124_v59 = vmax.f32 %v1122_v47, %v1123_v55  ;;  %v1130_v2 = vrot.slane %v1129_v17, 4  ;;  %v1137_v3 = vrot.slane %v1136_v52, 4  ;;  %v1143_v39 = vsel %vm981_vm7, %v914_v54, -inf }
 0x190   : > { %v1099_v14 = vrot.slane %v1098_v27, 1  ;;  %v1105_v7 = vmax.f32 %v1103_v51, %v1104_v57  ;;  %v1112_v9 = vmax.f32 %v1110_v8, %v1111_v38  ;;  %v1118_v11 = vrot.slane %v1117_v58, 2 }
 0x191   : > { %v1125_v16 = vrot.slane %v1124_v59, 2  ;;  %v1131_v15 = vmax.f32 %v1129_v17, %v1130_v2  ;;  %v1138_v18 = vmax.f32 %v1136_v52, %v1137_v3  ;;  %v1144_v19 = vrot.slane %v1143_v39, 4 }
 0x192   : > { %v1100_v1 = vmax.f32 %v1098_v27, %v1099_v14  ;;  %v1106_v20 = vrot.slane %v1105_v7, 1  ;;  %v1113_v23 = vrot.slane %v1112_v9, 1  ;;  %v1119_v24 = vmax.f32 %v1117_v58, %v1118_v11 }
 0x193   : > { %v1126_v25 = vmax.f32 %v1124_v59, %v1125_v16  ;;  %v1132_v26 = vrot.slane %v1131_v15, 2  ;;  %v1139_v28 = vrot.slane %v1138_v18, 2  ;;  %v1145_v60 = vmax.f32 %v1143_v39, %v1144_v19 }
 0x194   : > { %v1107_v29 = vmax.f32 %v1105_v7, %v1106_v20  ;;  %v1114_v4 = vmax.f32 %v1112_v9, %v1113_v23  ;;  %v1120_v31 = vrot.slane %v1119_v24, 1  ;;  %vm1222_vm12 = vcmp.gt.f32.partialorder %v1100_v1, 0.0 }
 0x195   : > { %v1254_v32 = vmul.f32 0.01, %v1100_v1  ;;  %v1127_v0 = vrot.slane %v1126_v25, 1  ;;  %v1133_v22 = vmax.f32 %v1131_v15, %v1132_v26  ;;  %v1140_v10 = vmax.f32 %v1138_v18, %v1139_v28 }
 0x196   : > { %v1121_v44 = vmax.f32 %v1119_v24, %v1120_v31  ;;  %vm1223_vm15 = vcmp.gt.f32.partialorder %v1107_v29, 0.0  ;;  %vm1224_vm0 = vcmp.gt.f32.partialorder %v1114_v4, 0.0  ;;  %v1255_v5 = vmul.f32 0.01, %v1107_v29 }
 0x197   : > { %v1256_v30 = vmul.f32 0.01, %v1114_v4  ;;  %v1286_v46 = vsel %vm1222_vm12, %v1100_v1, %v1254_v32  ;;  %v1128_v40 = vmax.f32 %v1126_v25, %v1127_v0  ;;  %v1134_v33 = vrot.slane %v1133_v22, 1 }
 0x198   : > { %vm1225_vm2 = vcmp.gt.f32.partialorder %v1121_v44, 0.0  ;;  %v1257_v61 = vmul.f32 0.01, %v1121_v44  ;;  %v1287_v6 = vsel %vm1223_vm15, %v1107_v29, %v1255_v5  ;;  %v1141_v48 = vrot.slane %v1140_v10, 1 }
 0x199   : > { %v1288_v42 = vsel %vm1224_vm0, %v1114_v4, %v1256_v30  ;;  %v1355_v13 = vsel %vm1334_vm8, %v1287_v6, %v1286_v46  ;;  %v1135_v35 = vmax.f32 %v1133_v22, %v1134_v33  ;;  %v1146_v34 = vrot.slane %v1145_v60, 2 }
 0x19a   : > { %v1289_v12 = vsel %vm1225_vm2, %v1121_v44, %v1257_v61  ;;  %v1356_v43 = vsel %vm1336_vm9, %v1288_v42, %v1355_v13  ;;  %v1142_v45 = vmax.f32 %v1140_v10, %v1141_v48  ;;  %vm1226_vm3 = vcmp.gt.f32.partialorder %v1128_v40, 0.0 }
 0x19b   : > { %v1147_v56 = vmax.f32 %v1145_v60, %v1146_v34  ;;  %vm1227_vm4 = vcmp.gt.f32.partialorder %v1135_v35, 0.0  ;;  %v1258_v63 = vmul.f32 0.01, %v1128_v40  ;;  %v1259_v47 = vmul.f32 0.01, %v1135_v35 }
 0x19c   : > { %vm1228_vm5 = vcmp.gt.f32.partialorder %v1142_v45, 0.0  ;;  %v1260_v50 = vmul.f32 0.01, %v1142_v45  ;;  %v1357_v51 = vsel %vm1338_vm10, %v1289_v12, %v1356_v43  ;;  %v922_v8 = vrot.slane %v2282_v36, %v2168_v41 }
 0x19d   : > { %v1148_v53 = vrot.slane %v1147_v56, 1  ;;  %v1290_v54 = vsel %vm1226_vm3, %v1128_v40, %v1258_v63  ;;  %v1291_v55 = vsel %vm1227_vm4, %v1135_v35, %v1259_v47  ;;  %v929_v17 = vrot.slane %v915_v49, %v2168_v41 }
 0x19e   : > { %v1292_v52 = vsel %vm1228_vm5, %v1142_v45, %v1260_v50  ;;  %v1358_v27 = vsel %vm1340_vm11, %v1290_v54, %v1357_v51  ;;  %v930_v57 = vcombine.high %v922_v8, %v922_v8  ;;  %v1150_v38 = vsel %vm981_vm7, %v922_v8, -inf }
 0x19f   : > { %v1149_v58 = vmax.f32 %v1147_v56, %v1148_v53  ;;  %v1359_v59 = vsel %vm1342_vm13, %v1291_v55, %v1358_v27  ;;  %v931_v2 = vcombine.high %v929_v17, %v929_v17  ;;  %v1151_v3 = vrot.slane %v1150_v38, 4 }
 0x1a0   : > { %v1360_v39 = vsel %vm1344_vm14, %v1292_v52, %v1359_v59  ;;  %v1157_v14 = vsel %vm981_vm7, %v930_v57, -inf  ;;  %v1164_v7 = vsel %vm981_vm7, %v929_v17, -inf  ;;  %v1565_v36 = vadd.f32 %v2208_v21, %v2231_v37 }
 0x1a1   : > { %vm1229_vm6 = vcmp.gt.f32.partialorder %v1149_v58, 0.0  ;;  %v1261_v49 = vmul.f32 0.01, %v1149_v58  ;;  %v1152_v9 = vmax.f32 %v1150_v38, %v1151_v3  ;;  %v1158_v11 = vrot.slane %v1157_v14, 4 }
 0x1a2   : > { %v1165_v16 = vrot.slane %v1164_v7, 4  ;;  %v1171_v15 = vsel %vm981_vm7, %v931_v2, -inf  ;;  %v804_v18 = vmax.f32 %v2273_v62, %v1565_v36 }
 0x1a3   : > { %v1293_v19 = vsel %vm1229_vm6, %v1149_v58, %v1261_v49  ;;  %v1153_v1 = vrot.slane %v1152_v9, 2  ;;  %v1159_v20 = vmax.f32 %v1157_v14, %v1158_v11  ;;  %v1172_v23 = vrot.slane %v1171_v15, 4 }
 0x1a4   : > { %v1361_v24 = vsel %vm1346_vm1, %v1293_v19, %v1360_v39  ;;  %v1166_v25 = vmax.f32 %v1164_v7, %v1165_v16  ;;  %v932_v26 = vcombine.high %v804_v18, %v804_v18  ;;  %v939_v21 = vrot.slane %v804_v18, %v2168_v41 }
 0x1a5   : > { %v1154_v37 = vmax.f32 %v1152_v9, %v1153_v1  ;;  %v1160_v28 = vrot.slane %v1159_v20, 2  ;;  %v1173_v60 = vmax.f32 %v1171_v15, %v1172_v23  ;;  %1375 = vst [vmem:[%s2247_s17 + $0x10] sm:$0xff] %v1361_v24 }
 0x1a6   : > { %v1167_v29 = vrot.slane %v1166_v25, 2  ;;  %v946_v4 = vrot.slane %v932_v26, %v2168_v41  ;;  %v947_v31 = vcombine.high %v939_v21, %v939_v21  ;;  %v1178_v62 = vsel %vm981_vm7, %v939_v21, -inf }
 0x1a7   : > { %v1155_v32 = vrot.slane %v1154_v37, 1  ;;  %v1161_v0 = vmax.f32 %v1159_v20, %v1160_v28  ;;  %v1174_v22 = vrot.slane %v1173_v60, 2  ;;  %v1179_v10 = vrot.slane %v1178_v62, 4 }
 0x1a8   : > { %v1168_v44 = vmax.f32 %v1166_v25, %v1167_v29  ;;  %v948_v5 = vcombine.high %v946_v4, %v946_v4  ;;  %v1185_v30 = vsel %vm981_vm7, %v947_v31, -inf  ;;  %v1192_v46 = vsel %vm981_vm7, %v946_v4, -inf }
 0x1a9   : > { %v1156_v40 = vmax.f32 %v1154_v37, %v1155_v32  ;;  %v1162_v33 = vrot.slane %v1161_v0, 1  ;;  %v1175_v61 = vmax.f32 %v1173_v60, %v1174_v22  ;;  %v1180_v6 = vmax.f32 %v1178_v62, %v1179_v10 }
 0x1aa   : > { %v1169_v48 = vrot.slane %v1168_v44, 1  ;;  %v1186_v42 = vrot.slane %v1185_v30, 4  ;;  %v1193_v41 = vrot.slane %v1192_v46, 4  ;;  %v1199_v13 = vsel %vm981_vm7, %v948_v5, -inf }
 0x1ab   : > { %v1163_v35 = vmax.f32 %v1161_v0, %v1162_v33  ;;  %v1176_v34 = vrot.slane %v1175_v61, 1  ;;  %vm1230_vm12 = vcmp.gt.f32.partialorder %v1156_v40, 0.0  ;;  %v1262_v12 = vmul.f32 0.01, %v1156_v40 }
 0x1ac   : > { %v1170_v43 = vmax.f32 %v1168_v44, %v1169_v48  ;;  %v1181_v45 = vrot.slane %v1180_v6, 2  ;;  %v1187_v56 = vmax.f32 %v1185_v30, %v1186_v42  ;;  %v1194_v63 = vmax.f32 %v1192_v46, %v1193_v41 }
 0x1ad   : > { %v1177_v47 = vmax.f32 %v1175_v61, %v1176_v34  ;;  %vm1231_vm15 = vcmp.gt.f32.partialorder %v1163_v35, 0.0  ;;  %v1263_v50 = vmul.f32 0.01, %v1163_v35  ;;  %v1294_v51 = vsel %vm1230_vm12, %v1156_v40, %v1262_v12 }
 0x1ae   : > { %vm1232_vm0 = vcmp.gt.f32.partialorder %v1170_v43, 0.0  ;;  %v1264_v8 = vmul.f32 0.01, %v1170_v43  ;;  %v1182_v53 = vmax.f32 %v1180_v6, %v1181_v45  ;;  %v1188_v54 = vrot.slane %v1187_v56, 2 }
 0x1af   : > { %vm1233_vm2 = vcmp.gt.f32.partialorder %v1177_v47, 0.0  ;;  %v1265_v55 = vmul.f32 0.01, %v1177_v47  ;;  %v1295_v17 = vsel %vm1231_vm15, %v1163_v35, %v1263_v50  ;;  %v1195_v52 = vrot.slane %v1194_v63, 2 }
 0x1b0   : > { %v1296_v27 = vsel %vm1232_vm0, %v1170_v43, %v1264_v8  ;;  %v1362_v57 = vsel %vm1334_vm8, %v1295_v17, %v1294_v51  ;;  %v1183_v38 = vrot.slane %v1182_v53, 1  ;;  %v1189_v58 = vmax.f32 %v1187_v56, %v1188_v54 }
 0x1b1   : > { %v1297_v59 = vsel %vm1233_vm2, %v1177_v47, %v1265_v55  ;;  %v1363_v2 = vsel %vm1336_vm9, %v1296_v27, %v1362_v57  ;;  %v1196_v3 = vmax.f32 %v1194_v63, %v1195_v52  ;;  %v1200_v39 = vrot.slane %v1199_v13, 4 }
 0x1b2   : > { %v1184_v14 = vmax.f32 %v1182_v53, %v1183_v38  ;;  %v1190_v7 = vrot.slane %v1189_v58, 1  ;;  %v1364_v16 = vsel %vm1338_vm10, %v1297_v59, %v1363_v2 }
 0x1b3   : > { %v1197_v36 = vrot.slane %v1196_v3, 1  ;;  %v1201_v49 = vmax.f32 %v1199_v13, %v1200_v39 }
 0x1b4   : > { %v1191_v9 = vmax.f32 %v1189_v58, %v1190_v7  ;;  %vm1234_vm7 = vcmp.gt.f32.partialorder %v1184_v14, 0.0  ;;  %v1266_v11 = vmul.f32 0.01, %v1184_v14 }
 0x1b5   : > { %v1198_v15 = vmax.f32 %v1196_v3, %v1197_v36  ;;  %v1202_v18 = vrot.slane %v1201_v49, 2 }
 0x1b6   : > { %vm1235_vm8 = vcmp.gt.f32.partialorder %v1191_v9, 0.0  ;;  %v1267_v19 = vmul.f32 0.01, %v1191_v9  ;;  %v1298_v1 = vsel %vm1234_vm7, %v1184_v14, %v1266_v11 }
 0x1b7   : > { %v1203_v20 = vmax.f32 %v1201_v49, %v1202_v18  ;;  %vm1236_vm9 = vcmp.gt.f32.partialorder %v1198_v15, 0.0  ;;  %v1268_v23 = vmul.f32 0.01, %v1198_v15  ;;  %v1365_v24 = vsel %vm1340_vm11, %v1298_v1, %v1364_v16 }
 0x1b8   : > { %v1299_v25 = vsel %vm1235_vm8, %v1191_v9, %v1267_v19 }
 0x1b9   : > { %v1204_v26 = vrot.slane %v1203_v20, 1  ;;  %v1300_v21 = vsel %vm1236_vm9, %v1198_v15, %v1268_v23  ;;  %v1366_v37 = vsel %vm1342_vm13, %v1299_v25, %v1365_v24 }
 0x1ba   : > { %v1367_v28 = vsel %vm1344_vm14, %v1300_v21, %v1366_v37 }
 0x1bb   : > { %v1205_v60 = vmax.f32 %v1203_v20, %v1204_v26 }
 0x1bd   : > { %vm1237_vm10 = vcmp.gt.f32.partialorder %v1205_v60, 0.0  ;;  %v1269_v29 = vmul.f32 0.01, %v1205_v60 }
 0x1bf   : > { %v1301_v4 = vsel %vm1237_vm10, %v1205_v60, %v1269_v29 }
 0x1c0   : > { %v1368_v31 = vsel %vm1346_vm1, %v1301_v4, %v1367_v28 }
 0x1c1   : > { %1376 = vst [vmem:[%s2247_s17 + $0x18] sm:$0xff] %v1368_v31 }
 0x1c2   : > { %1761 = shalt.err (!%p1758_p7)
}
 0x1c3   : > { %s1762_s24 = scalar_lea.hbm %s2331_s4, 512  ;;  %s1766_s26 = scalar_lea.hbm %s2381_s2, 1024 }
 0x1c4   : > { %p1763_p9 = scmp.ne.s32.totalorder %s2331_s4, %s1762_s24  ;;  %p1767_p5 = scmp.lt.u32.totalorder %s2331_s4, %s2381_s2 }
 0x1c5   : > { %p1768_p11 = scmp.lt.u32.totalorder %s1766_s26, %s1762_s24  ;;  %p1770_p4 = scmp.lt.u32.totalorder %s1762_s24, %s2331_s4 }
 0x1c6   : > { %p1764_p2 = pnand %p1763_p9, %p1937_p12 }
 0x1c7   : > { %p1769_p1 = por %p1768_p11, %p1767_p5 }
 0x1c8   : > { %p1765_p0 = pneg %p1764_p2 }
 0x1c9   : > { %p1771_p6 = por %p1770_p4, %p1769_p1 }
 0x1cb   : > { %p1772_p8 = pnand %p1771_p6, %p1765_p0 }
 0x1cd   : > { %1775 = shalt.err (!%p1772_p8)
}
 0x1ce   : > { %s1829_s3 = smov 128   ;;  %s1830_s15 = smov 8  }
 0x1cf   : > { %1591 = dma.vmem_to_hbm [thread:$0]  (%p1937_p12), %s2333_s19, 512, %s2331_s4, %s1378_s5, %s1829_s3, %s1829_s3, %s1830_s15  }
 0x1d0 PF: > { %s1406_s17 = sand.u32 1, %s1806_s9   ;;  %p2400_p10 = scmp.ne.s32.totalorder %s2386_s16, 0 }
 0x1d1   : > { %p2401_p13 = scmp.ge.s32.totalorder %s1818_s12, 2  ;;  %s1407_s27 = scalar_lea.sflag [#allocation4], %s1406_s17 }
 0x1d3   : > { %p1602_p3 = pnand %p2401_p13, %p2400_p10 }
 0x1d5   : > { %1801 = dma.done.wait (!%p1602_p3), %s1407_s27, 512  }
 0x1d6   : > { %1803 = vsyncadd (!%p1602_p3), %s1407_s27, 4294966784  ;;  %p16_p7 = scmp.ge.s32.totalorder %s1902_s21, 4   ;;  %s2402_s9 = smov %s1810_s10 }
 0x1d7   : > { %s2403_s10 = smov %s1814_s11  ;;  %s2404_s11 = smov %s1933_s8 }
 0x1d8   : > { %s2405_s12 = smov %s1902_s21  ;;  %18 = sbr.rel (!%p16_p7) target bundleno = 6 (0x6), region = 79 }
 0x1df   :  { %1412 = vsyncpa [#allocation3], 1 }
 0x1e0   :  { %1414 = vsyncpa [#allocation3 + $0x1], 1 }
 0x1e1   :  { %1415 = vsyncpa [#allocation6], 1 }
 0x1e2   :  { %1416 = vsyncpa [#allocation4], 1 }
 0x1e3   :  { %1418 = vsyncpa [#allocation4 + $0x1], 1 }

</bundles_post_ra>
